<compile_context>
chip_gen: v5e
topology: v5e:2x2
jax: 0.10.0
libtpu: 0.0.40
codegen_flags: <defaults>
</compile_context>

<pallas_src>
import math

import jax
import jax.numpy as jnp
from jax.experimental import pallas as pl
from jax.experimental.pallas import tpu as pltpu

BETA = 50.0
THRESHOLD = 20.0                     # PyTorch F.softplus default threshold
_INV_BETA = 1.0 / BETA
_EXP_NEG_BETA = math.exp(-BETA)      # exp(-50) ~ 1.93e-22 (normal in f32)

_LANES = 128
_SUBLANES = 8
_TARGET_BLOCK_BYTES = 4 * 1024 * 1024    # per block; x2 buffers x (in+out) ~ 16 MiB VMEM
_VMEM_LIMIT_BYTES = 32 * 1024 * 1024     # within physical VMEM on v5e/v6e/v7x
_MIN_COLS_FOR_SPLIT = 1024               # >= 8K elems: force >=2 grid steps (v7x dual-TC)


def _cdiv(a, b):
    return -(-a // b)


def _smooth_clamped_relu_kernel(x_ref, o_ref):
    # f(x) = sp(x) - sp(sp(x) - 1) with sp = softplus(beta=50, threshold=20),
    # restructured to a single exp + single log1p per element:
    #   z <= 20      : sp(x) = log1p(e^z)/50 (< 0.41)  =>  sp(x) - 1 < 0 and
    #                  sp(sp(x)-1) = log1p((1+e^z)*e^-50)/50 ~= (1+e^z)*e^-50/50
    #                  (argument < 1e-13, so log1p(y) == y to f32 precision)
    #   20 < z <= 70 : sp(x) = x,  sp(x-1) = log1p(e^(z-50))/50
    #   z > 70       : sp(x) = x,  sp(x-1) = x-1   =>  result = 1 exactly
    # TODO(synk): for bf16 I/O on v6e/v7x the math could stay in bf16 (halves
    # EUP/vreg cost); kept in f32 for one portable, accurate path (incl. v5e).
    x = x_ref[...].astype(jnp.float32)
    z = x * BETA
    lin1 = z > THRESHOLD                  # first softplus takes linear branch
    lin2 = z > THRESHOLD + BETA           # both linear -> result is exactly 1
    arg = jnp.where(lin1, z - BETA, z)
    e = jnp.exp(jnp.minimum(arg, THRESHOLD))   # the only exp
    l = jnp.log1p(e)                           # the only log
    res_low = l * _INV_BETA - (1.0 + e) * (_EXP_NEG_BETA * _INV_BETA)
    res_mid = x - l * _INV_BETA
    out = jnp.where(lin1, jnp.where(lin2, 1.0, res_mid), res_low)
    o_ref[...] = out.astype(o_ref.dtype)


def smooth_clamped_relu(x: jax.Array) -> jax.Array:
    """Applies SmoothClampedReLU(beta=50) elementwise. Any shape / float dtype."""
    orig_shape = x.shape
    orig_dtype = x.dtype
    itemsize = jnp.dtype(orig_dtype).itemsize

    flat = x.reshape(-1)                 # free for contiguous inputs
    n = flat.shape[0]

    # Lane-dense (8, n//8) view; grid tiles the lane axis, Pallas masks the
    # ragged last block, so no pad/slice HBM passes when n % 8 == 0.
    pad = (-n) % _SUBLANES
    if pad:
        # TODO(synk): rare truly-odd sizes (n % 8 != 0) still pay a tiny pad +
        # slice pass; an in-kernel iota mask on a (1, n) view would remove it.
        flat = jnp.pad(flat, (0, pad))
    n_cols = (n + pad) // _SUBLANES
    x2d = flat.reshape(_SUBLANES, n_cols)

    # Block width: ~_TARGET_BLOCK_BYTES per block, near-equal blocks, and at
    # least two grid steps for mid/large inputs (v7x dual-TC sharding).
    target_bw = max(_LANES, _TARGET_BLOCK_BYTES // (_SUBLANES * itemsize))
    n_blocks = _cdiv(n_cols, target_bw)
    if n_blocks == 1 and n_cols >= _MIN_COLS_FOR_SPLIT:
        n_blocks = 2
    bw = _cdiv(n_cols, n_blocks)
    bw = _cdiv(bw, _LANES) * _LANES          # round up to a lane multiple
    if bw >= n_cols:
        bw = n_cols                          # single full-extent block (always legal)
    grid = _cdiv(n_cols, bw)

    cost = pl.CostEstimate(
        flops=12 * n,
        transcendentals=2 * n,
        bytes_accessed=2 * n * itemsize,
    )

    out2d = pl.pallas_call(
        _smooth_clamped_relu_kernel,
        out_shape=jax.ShapeDtypeStruct(x2d.shape, orig_dtype),
        grid=(grid,),
        in_specs=[pl.BlockSpec((_SUBLANES, bw), lambda i: (0, i))],
        out_specs=pl.BlockSpec((_SUBLANES, bw), lambda i: (0, i)),
        compiler_params=pltpu.CompilerParams(
            dimension_semantics=("parallel",),
            vmem_limit_bytes=_VMEM_LIMIT_BYTES,
        ),
        cost_estimate=cost,
    )(x2d)

    out = out2d.reshape(-1)
    if pad:
        out = out[:n]
    return out.reshape(orig_shape)


def _reference(x):
    # Pure-JAX reference mirroring torch.nn.functional.softplus semantics.
    def sp(v):
        z = v * BETA
        return jnp.where(z > THRESHOLD, v,
                         jnp.log1p(jnp.exp(jnp.minimum(z, THRESHOLD))) / BETA)
    a = sp(x)
    return a - sp(a - 1.0)


if __name__ == "__main__":
    # NCHW-style input consistent with typical usage: batch=2, channels=4, 16x16.
    x = jax.random.normal(jax.random.PRNGKey(0), (2, 4, 16, 16), dtype=jnp.float32) * 2.0
    y = jax.block_until_ready(smooth_clamped_relu(x))
    assert y.shape == x.shape and y.dtype == x.dtype
    assert jnp.allclose(y, _reference(x), atol=1e-5, rtol=1e-5)

    # Ragged (n % 8 != 0) shape exercises the small pad/slice fallback path.
    x2 = jax.random.normal(jax.random.PRNGKey(1), (3, 5, 7, 11), dtype=jnp.float32)
    y2 = jax.block_until_ready(smooth_clamped_relu(x2))
    assert y2.shape == x2.shape
    assert jnp.allclose(y2, _reference(x2), atol=1e-5, rtol=1e-5)

    # Multi-block grid with a partial (masked) last block, no padding needed.
    x3 = jax.random.normal(jax.random.PRNGKey(2), (8, 1100), dtype=jnp.float32)
    y3 = jax.block_until_ready(smooth_clamped_relu(x3))
    assert y3.shape == x3.shape
    assert jnp.allclose(y3, _reference(x3), atol=1e-5, rtol=1e-5)

    print("KERNEL_OK")
</pallas_src>

<mosaic_0001>
module attributes {stable_mosaic.version = 11 : i64} {
  func.func @_smooth_clamped_relu_kernel(%arg0: i32, %arg1: memref<8x256xf32, #tpu.memory_space<vmem>>, %arg2: memref<8x256xf32, #tpu.memory_space<vmem>>) attributes {dimension_semantics = [#tpu.dimension_semantics<parallel>], iteration_bounds = array<i64: 1>, scalar_prefetch = 0 : i64, scratch_operands = 0 : i64, tpu.core_type = #tpu.core_type<tc>, window_params = [{transform_indices = @transform_0, window_bounds = array<i64: 8, 256>}, {transform_indices = @transform_1, window_bounds = array<i64: 8, 256>}]} {
    %c0 = arith.constant 0 : index
    %c0_0 = arith.constant 0 : index
    %0 = vector.load %arg1[%c0, %c0_0] : memref<8x256xf32, #tpu.memory_space<vmem>>, vector<8x256xf32>
    %cst = arith.constant 5.000000e+01 : f32
    %1 = vector.broadcast %cst : f32 to vector<8x256xf32>
    %2 = arith.mulf %0, %1 : vector<8x256xf32>
    %cst_1 = arith.constant 2.000000e+01 : f32
    %3 = vector.broadcast %cst_1 : f32 to vector<8x256xf32>
    %4 = arith.cmpf ogt, %2, %3 : vector<8x256xf32>
    %cst_2 = arith.constant 7.000000e+01 : f32
    %5 = vector.broadcast %cst_2 : f32 to vector<8x256xf32>
    %6 = arith.cmpf ogt, %2, %5 : vector<8x256xf32>
    %cst_3 = arith.constant 5.000000e+01 : f32
    %7 = vector.broadcast %cst_3 : f32 to vector<8x256xf32>
    %8 = arith.subf %2, %7 : vector<8x256xf32>
    %9 = arith.select %4, %8, %2 : vector<8x256xi1>, vector<8x256xf32>
    %cst_4 = arith.constant 2.000000e+01 : f32
    %10 = vector.broadcast %cst_4 : f32 to vector<8x256xf32>
    %11 = arith.minimumf %9, %10 : vector<8x256xf32>
    %12 = math.exp %11 : vector<8x256xf32>
    %13 = math.log1p %12 : vector<8x256xf32>
    %cst_5 = arith.constant 2.000000e-02 : f32
    %14 = vector.broadcast %cst_5 : f32 to vector<8x256xf32>
    %15 = arith.mulf %13, %14 : vector<8x256xf32>
    %cst_6 = arith.constant 1.000000e+00 : f32
    %16 = vector.broadcast %cst_6 : f32 to vector<8x256xf32>
    %17 = arith.addf %16, %12 : vector<8x256xf32>
    %cst_7 = arith.constant 3.857500e-24 : f32
    %18 = vector.broadcast %cst_7 : f32 to vector<8x256xf32>
    %19 = arith.mulf %17, %18 : vector<8x256xf32>
    %20 = arith.subf %15, %19 : vector<8x256xf32>
    %cst_8 = arith.constant 2.000000e-02 : f32
    %21 = vector.broadcast %cst_8 : f32 to vector<8x256xf32>
    %22 = arith.mulf %13, %21 : vector<8x256xf32>
    %23 = arith.subf %0, %22 : vector<8x256xf32>
    %cst_9 = arith.constant 1.000000e+00 : f32
    %24 = vector.broadcast %cst_9 : f32 to vector<8x256xf32>
    %25 = arith.select %6, %24, %23 : vector<8x256xi1>, vector<8x256xf32>
    %26 = arith.select %4, %25, %20 : vector<8x256xi1>, vector<8x256xf32>
    %c0_10 = arith.constant 0 : index
    %c0_11 = arith.constant 0 : index
    %27 = vector.load %arg2[%c0_10, %c0_11] : memref<8x256xf32, #tpu.memory_space<vmem>>, vector<8x256xf32>
    tpu.vector_store %arg2[%c0_10, %c0_11], %26 {strides = array<i32>} : memref<8x256xf32, #tpu.memory_space<vmem>>, vector<8x256xf32>,
    return
  }
  func.func @transform_0(%arg0: i32) -> (i32, i32) {
    %c0_i32 = arith.constant 0 : i32
    %c0_i32_0 = arith.constant 0 : i32
    return %c0_i32, %arg0 : i32, i32
  }
  func.func @transform_1(%arg0: i32) -> (i32, i32) {
    %c0_i32 = arith.constant 0 : i32
    %c0_i32_0 = arith.constant 0 : i32
    return %c0_i32, %arg0 : i32, i32
  }
}

</mosaic_0001>

<bundles_post_ra>
// kernel: tpu_custom_call.1
= control target key start
LH: loop header
LB: loop body
LE: loop exit
PB: predicated region body
PF: predicated region fallthrough
CT: control target
= control target key end

     0   :  { %6 = vsyncpa [#allocation3], 0  ;;  %s178_s0 = inlined_call_operand.hbm [shape: f32[8,256], index: 0, kind: input, shape index: {}]   ;;  %s179_s1 = inlined_call_operand.hbm [shape: f32[8,256], index: 1, kind: output, shape index: {}]  }
   0x1   :  { %7 = vsyncpa [#allocation4], 0  ;;  %s13_s8 = sshll.u32 %s178_s0, 4  ;;  %s156_s9 = smov [#allocation2]   ;;  %s14_s8 = int_to_ptr.hbm [resolvable:$true] %s13_s8 }
   0x2   :  { %s15_s10 = sshll.u32 %s156_s9, 4  ;;  %s16_s10 = int_to_ptr.vmem [resolvable:$true] %s15_s10 }
   0x3   :  { %18 = dma.hbm_to_vmem [thread:$0]  %s14_s8, 256, %s16_s10, [#allocation3]  }
   0x4   :  { %152 = dma.done.wait [#allocation3], 256  }
   0x5   :  { %153 = vsyncadd [#allocation3], 4294967040  ;;  %v23_v0 = vld [vmem:[#allocation2] sm:$0xff]  ;;  %v24_v1 = vld [vmem:[#allocation2 + $0x8] sm:$0xff]  ;;  %s157_s0 = smov [#allocation5]   ;;  %s82_s14 = sshll.u32 %s179_s1, 4  ;;  %s83_s14 = int_to_ptr.hbm [resolvable:$true] %s82_s14 }
   0x6   :  { %v25_v2 = vmul.f32 50.0, %v23_v0  ;;  %v26_v3 = vmul.f32 50.0, %v24_v1  ;;  %s80_s11 = sshll.u32 %s157_s0, 4  ;;  %s81_s11 = int_to_ptr.vmem [resolvable:$true] %s80_s11 }
   0x8   :  { %vm27_vm0 = vcmp.gt.f32.partialorder %v25_v2, 20.0  ;;  %v92_v4 = vadd.f32 -50.0, %v25_v2  ;;  %vm28_vm1 = vcmp.gt.f32.partialorder %v26_v3, 20.0  ;;  %v93_v5 = vadd.f32 -50.0, %v26_v3 }
   0x9   :  { %vm29_vm4 = vcmp.gt.f32.partialorder %v25_v2, 70.0  ;;  %vm30_vm5 = vcmp.gt.f32.partialorder %v26_v3, 70.0 }
   0xa   :  { %v33_v6 = vsel %vm27_vm0, %v92_v4, %v25_v2  ;;  %v34_v8 = vsel %vm28_vm1, %v93_v5, %v26_v3 }
   0xb   :  { %v35_v7 = vmin.f32 %v33_v6, 20.0  ;;  %v36_v9 = vmin.f32 %v34_v8, 20.0 }
   0xd   :  { %v37_v10 = vmul.f32 1.442695, %v35_v7  ;;  %v39_v11 = vmul.f32 1.442695, %v36_v9 }
   0xf   :  { %96 = vpow2.f32 %v37_v10 }
  0x10   :  { %98 = vpow2.f32 %v39_v11 }
  0x15   :  { %v97_v12 = vpop.eup %96 }
  0x16   :  { %v99_v13 = vpop.eup %98  ;;  %v41_v14 = vadd.f32 1.0, %v97_v12  ;;  %v44_v15 = vmul.f32 -0.5, %v97_v12  ;;  %v47_v19 = vand.u32 2147483647, %v97_v12 }
  0x17   :  { %v50_v16 = vadd.f32 1.0, %v99_v13  ;;  %v53_v17 = vmul.f32 -0.5, %v99_v13  ;;  %v56_v21 = vand.u32 2147483647, %v99_v13 }
  0x18   :  { %100 = vlog2.f32 %v41_v14  ;;  %v45_v18 = vadd.f32 1.0, %v44_v15  ;;  %vm48_vm2 = vcmp.lt.f32.partialorder %v47_v19, 0.0004427343  ;;  %v63_v27 = vmul.f32 3.8575e-24, %v41_v14 }
  0x19   :  { %102 = vlog2.f32 %v50_v16  ;;  %v54_v20 = vadd.f32 1.0, %v53_v17  ;;  %vm57_vm3 = vcmp.lt.f32.partialorder %v56_v21, 0.0004427343  ;;  %v64_v30 = vmul.f32 3.8575e-24, %v50_v16 }
  0x1a   :  { %v46_v22 = vmul.f32 %v97_v12, %v45_v18 }
  0x1b   :  { %v55_v24 = vmul.f32 %v99_v13, %v54_v20 }
  0x1e   :  { %v101_v23 = vpop.eup %100 }
  0x1f   :  { %v103_v25 = vpop.eup %102  ;;  %v43_v26 = vmul.f32 0.6931472, %v101_v23 }
  0x20   :  { %v52_v28 = vmul.f32 0.6931472, %v103_v25 }
  0x21   :  { %v49_v29 = vsel %vm48_vm2, %v46_v22, %v43_v26 }
  0x22   :  { %v59_v31 = vmul.f32 0.02, %v49_v29  ;;  %v58_v32 = vsel %vm57_vm3, %v55_v24, %v52_v28 }
  0x23   :  { %v60_v33 = vmul.f32 0.02, %v58_v32 }
  0x24   :  { %v65_v34 = vsub.f32 %v59_v31, %v63_v27  ;;  %v67_v35 = vsub.f32 %v23_v0, %v59_v31 }
  0x25   :  { %v66_v36 = vsub.f32 %v60_v33, %v64_v30  ;;  %v68_v37 = vsub.f32 %v24_v1, %v60_v33 }
  0x26   :  { %v69_v38 = vsel %vm29_vm4, 1.0, %v67_v35 }
  0x27   :  { %v71_v39 = vsel %vm27_vm0, %v69_v38, %v65_v34  ;;  %v70_v40 = vsel %vm30_vm5, 1.0, %v68_v37 }
  0x28   :  { %73 = vst [vmem:[#allocation5] sm:$0xff] %v71_v39  ;;  %v72_v41 = vsel %vm28_vm1, %v70_v40, %v66_v36 }
  0x29   :  { %74 = vst [vmem:[#allocation5 + $0x8] sm:$0xff] %v72_v41 }
  0x2a   :  { %85 = dma.vmem_to_hbm [thread:$0]  %s81_s11, 256, %s83_s14, [#allocation4]  }
  0x2b   :  { %154 = dma.done.wait [#allocation4], 256  }
  0x2c   :  { %155 = vsyncadd [#allocation4], 4294967040 }
  0x2d   :  { %90 = vsyncpa [#allocation3], 1 }
  0x2e   :  { %91 = vsyncpa [#allocation4], 1 }

</bundles_post_ra>
